<compile_context>
chip_gen: v7x
topology: tpu7x:2x2x1
jax: 0.10.0
libtpu: 0.0.40
codegen_flags: <defaults>
</compile_context>

<pallas_src>
import jax
import jax.numpy as jnp
from jax.experimental import pallas as pl
from jax.experimental.pallas import tpu as pltpu


def _attention_kernel(x_ref, w_ref, b_ref, o_ref, l_sc, acc_sc):
    # x_ref: (TB, TT, H) VMEM   w_ref: (1, H) VMEM   b_ref: (1,) SMEM (f32)
    # o_ref: (TB, H)            scratch: l (TB, 1) f32, acc (TB, H) f32
    t = pl.program_id(1)

    @pl.when(t == 0)
    def _():
        l_sc[...] = jnp.zeros_like(l_sc)
        acc_sc[...] = jnp.zeros_like(acc_sc)

    x = x_ref[...]                                   # native dtype, no f32 copy
    w = w_ref[...]                                   # (1, H), lane-dense

    # scores = tanh(<x, w> + b): multiply in native dtype, accumulate the lane
    # reduce in f32; keepdims keeps TT on the sublane axis -> (TB, TT, 1).
    s = jnp.sum(x * w, axis=-1, keepdims=True, dtype=jnp.float32) + b_ref[0]
    # tanh-bounded scores => exp(score) is in [1/e, e]; no running max needed.
    p = jnp.exp(jnp.tanh(s))                         # (TB, TT, 1) f32

    l_sc[...] += jnp.sum(p, axis=1)                  # (TB, 1)
    # Weighted sum over this tile; p broadcast over H is a cheap lane splat.
    acc_sc[...] += jnp.sum(x * p.astype(x.dtype), axis=1, dtype=jnp.float32)

    @pl.when(t == pl.num_programs(1) - 1)
    def _():
        inv = pl.reciprocal(l_sc[...], approx=False)  # once per output row
        o_ref[...] = (acc_sc[...] * inv).astype(o_ref.dtype)


def _vmem_capacity_bytes():
    try:
        cap = int(getattr(pltpu.get_tpu_info(), "vmem_capacity_bytes", 0))
        if cap > 0:
            return cap
    except Exception:
        pass
    return 128 << 20                                  # v5e / v6e default


def _choose_tiles(B, T, H, dtype, target_bytes):
    """Pick (TB, TT) dividing (B, T).  Second-to-last block dims must be a
    multiple of the dtype's sublane packing (8 f32 / 16 bf16 / 32 int8) or
    the full array extent; x blocks aim for `target_bytes` per grid step."""
    itemsize = jnp.dtype(dtype).itemsize
    sub = max(8, 32 // itemsize)

    def ok_b(tb):                       # (tb, H) output block: tb is 2nd-to-last
        return tb == B or tb % sub == 0

    def ok_t(tt):                       # (tb, tt, H) x block: tt is 2nd-to-last
        return tt == T or tt % sub == 0

    if B * T * H * itemsize <= target_bytes:
        return B, T                     # whole problem in one grid step

    row_bytes = T * H * itemsize
    # Largest valid divisor of B whose full-T slab stays under target.
    for cand in range(B, 0, -1):
        if B % cand == 0 and ok_b(cand) and cand * row_bytes <= target_bytes:
            return cand, T

    # Full-T slabs too big even for the smallest valid tb: tile T as well.
    tb = B
    for cand in range(1, B + 1):
        if B % cand == 0 and ok_b(cand):
            tb = cand
            break
    tt = T
    for cand in range(T, 0, -1):
        if T % cand == 0 and ok_t(cand) and tb * cand * H * itemsize <= target_bytes:
            tt = cand
            break
    if tb * tt * H * itemsize > target_bytes:
        for cand in range(1, T + 1):    # fall back to the smallest valid tt
            if T % cand == 0 and ok_t(cand):
                tt = cand
                break
    return tb, tt


def attention_layer(x, w, b):
    """x: (B, T, H); w: nn.Linear weight, (1, H), (H, 1) or (H,); b: (1,).

    Returns the attention-pooled context, shape (B, H)."""
    B, T, H = x.shape
    w = jnp.asarray(w)
    if w.ndim == 1:
        w = w.reshape(1, H)
    elif w.shape == (H, 1):
        w = w.T
    w = w.reshape(1, H).astype(x.dtype)               # lane-dense VPU layout
    b = jnp.asarray(b, dtype=jnp.float32).reshape(1)

    itemsize = jnp.dtype(x.dtype).itemsize
    cap = _vmem_capacity_bytes()

    # Block-size target: 2 pipeline buffers of x plus ~2 block-sized f32
    # elementwise temporaries must fit in ~70% of per-core VMEM.
    per_block_factor = 2 + 8 // itemsize              # f32: 4, bf16: 6, int8: 10
    budget = int(cap * 0.7) - (6 << 20)
    target = max(min(16 << 20, budget // per_block_factor), 1 << 20)

    tb, tt = _choose_tiles(B, T, H, x.dtype, target)
    grid = (B // tb, T // tt)

    x_block = tb * tt * H * itemsize
    out_block = tb * H * itemsize
    scratch = (tb + tb * H) * 4
    need = (2 * x_block                                # double-buffered input
            + 2 * tb * tt * H * 4                      # f32 elementwise temps
            + 2 * out_block                            # output buffers
            + scratch + (4 << 20))                     # scratch + slack
    vmem_limit = int(min(max(need, 32 << 20), int(cap * 0.75)))

    return pl.pallas_call(
        _attention_kernel,
        out_shape=jax.ShapeDtypeStruct((B, H), x.dtype),
        grid_spec=pltpu.PrefetchScalarGridSpec(
            num_scalar_prefetch=0,
            grid=grid,
            in_specs=[
                pl.BlockSpec((tb, tt, H), lambda i, t: (i, t, 0)),   # x tile
                pl.BlockSpec((1, H), lambda i, t: (0, 0)),           # w (1, H)
                pl.BlockSpec(memory_space=pltpu.MemorySpace.SMEM),   # bias
            ],
            out_specs=pl.BlockSpec((tb, H), lambda i, t: (i, 0)),
            scratch_shapes=[
                pltpu.VMEM((tb, 1), jnp.float32),   # softmax denominator l
                pltpu.VMEM((tb, H), jnp.float32),   # unnormalized context
            ],
        ),
        compiler_params=pltpu.CompilerParams(
            dimension_semantics=("parallel", "arbitrary"),
            vmem_limit_bytes=vmem_limit,
        ),
    )(x, w, b)


def attention_layer_ref(x, w, b):
    w = jnp.asarray(w)
    if w.ndim == 1:
        w = w.reshape(1, -1)
    elif w.shape == (x.shape[-1], 1):
        w = w.T
    scores = jnp.tanh(jnp.einsum("bth,oh->bto", x, w) + jnp.asarray(b).reshape(1))
    weights = jax.nn.softmax(scores[..., 0], axis=1)          # (B, T)
    return jnp.sum(x * weights[..., None], axis=1)            # (B, H)


if __name__ == "__main__":
    B, T, H = 2, 8, 32

    key = jax.random.PRNGKey(0)
    kx, kw, kb = jax.random.split(key, 3)
    x = jax.random.normal(kx, (B, T, H), dtype=jnp.float32)
    # nn.Linear(hidden_dim, 1): weight (1, H), bias (1,)
    w = jax.random.normal(kw, (1, H), dtype=jnp.float32) / jnp.sqrt(H)
    b = jax.random.normal(kb, (1,), dtype=jnp.float32) * 0.1

    out = attention_layer(x, w, b)
    jax.block_until_ready(out)

    ref = attention_layer_ref(x, w, b)
    assert out.shape == (B, H)
    assert jnp.allclose(out, ref, atol=1e-5, rtol=1e-5), "mismatch vs reference"

    print("KERNEL_OK")
</pallas_src>

<mosaic_0001>
module attributes {stable_mosaic.version = 11 : i64} {
  func.func @_attention_kernel(%arg0: i32, %arg1: i32, %arg2: memref<2x8x32xf32, #tpu.memory_space<vmem>>, %arg3: memref<1x32xf32, #tpu.memory_space<vmem>>, %arg4: memref<1xf32, #tpu.memory_space<smem>>, %arg5: memref<2x32xf32, #tpu.memory_space<vmem>>, %arg6: memref<2x1xf32, #tpu.memory_space<vmem>>, %arg7: memref<2x32xf32, #tpu.memory_space<vmem>>) attributes {dimension_semantics = [#tpu.dimension_semantics<parallel>, #tpu.dimension_semantics<arbitrary>], iteration_bounds = array<i64: 1, 1>, scalar_prefetch = 0 : i64, scratch_operands = 2 : i64, tpu.core_type = #tpu.core_type<tc>, window_params = [{transform_indices = @transform_0, window_bounds = array<i64: 2, 8, 32>}, {pipeline_mode = #tpu.pipeline_mode<synchronous>, transform_indices = @transform_1, window_bounds = array<i64: 1, 32>}, {transform_indices = @transform_2, window_bounds = array<i64: 1>}, {transform_indices = @transform_3, window_bounds = array<i64: 2, 32>}]} {
    %c0_i32 = arith.constant 0 : i32
    %0 = arith.cmpi eq, %arg1, %c0_i32 : i32
    %1 = arith.extui %0 : i1 to i32
    %c0_i32_0 = arith.constant 0 : i32
    %2 = arith.cmpi ne, %1, %c0_i32_0 : i32
    scf.if %2 {
      %cst_18 = arith.constant 0.000000e+00 : f32
      %28 = vector.broadcast %cst_18 : f32 to vector<2x1xf32>
      %c0_19 = arith.constant 0 : index
      %c0_20 = arith.constant 0 : index
      %29 = vector.load %arg6[%c0_19, %c0_20] : memref<2x1xf32, #tpu.memory_space<vmem>>, vector<2x1xf32>
      tpu.vector_store %arg6[%c0_19, %c0_20], %28 {strides = array<i32>} : memref<2x1xf32, #tpu.memory_space<vmem>>, vector<2x1xf32>,
      %cst_21 = arith.constant 0.000000e+00 : f32
      %30 = vector.broadcast %cst_21 : f32 to vector<2x32xf32>
      %c0_22 = arith.constant 0 : index
      %c0_23 = arith.constant 0 : index
      %31 = vector.load %arg7[%c0_22, %c0_23] : memref<2x32xf32, #tpu.memory_space<vmem>>, vector<2x32xf32>
      tpu.vector_store %arg7[%c0_22, %c0_23], %30 {strides = array<i32>} : memref<2x32xf32, #tpu.memory_space<vmem>>, vector<2x32xf32>,
    } else {
    }
    %c0 = arith.constant 0 : index
    %c0_1 = arith.constant 0 : index
    %c0_2 = arith.constant 0 : index
    %3 = vector.load %arg2[%c0, %c0_1, %c0_2] : memref<2x8x32xf32, #tpu.memory_space<vmem>>, vector<2x8x32xf32>
    %c0_3 = arith.constant 0 : index
    %c0_4 = arith.constant 0 : index
    %4 = vector.load %arg3[%c0_3, %c0_4] : memref<1x32xf32, #tpu.memory_space<vmem>>, vector<1x32xf32>
    %5 = vector.shape_cast %4 : vector<1x32xf32> to vector<1x1x32xf32>
    %6 = vector.broadcast %5 : vector<1x1x32xf32> to vector<2x8x32xf32>
    %7 = arith.mulf %3, %6 : vector<2x8x32xf32>
    %cst = arith.constant dense<0.000000e+00> : vector<2x8xf32>
    %8 = vector.multi_reduction <add>, %7, %cst [2] : vector<2x8x32xf32> to vector<2x8xf32>
    %9 = vector.shape_cast %8 : vector<2x8xf32> to vector<2x8x1xf32>
    %c0_5 = arith.constant 0 : index
    %10 = memref.load %arg4[%c0_5] : memref<1xf32, #tpu.memory_space<smem>>
    %11 = vector.broadcast %10 : f32 to vector<2x8x1xf32>
    %12 = arith.addf %9, %11 : vector<2x8x1xf32>
    %13 = math.tanh %12 : vector<2x8x1xf32>
    %14 = math.exp %13 : vector<2x8x1xf32>
    %c0_6 = arith.constant 0 : index
    %c0_7 = arith.constant 0 : index
    %15 = vector.load %arg6[%c0_6, %c0_7] : memref<2x1xf32, #tpu.memory_space<vmem>>, vector<2x1xf32>
    %cst_8 = arith.constant dense<0.000000e+00> : vector<2x1xf32>
    %16 = vector.multi_reduction <add>, %14, %cst_8 [1] : vector<2x8x1xf32> to vector<2x1xf32>
    %17 = arith.addf %15, %16 : vector<2x1xf32>
    %c0_9 = arith.constant 0 : index
    %c0_10 = arith.constant 0 : index
    %18 = vector.load %arg6[%c0_9, %c0_10] : memref<2x1xf32, #tpu.memory_space<vmem>>, vector<2x1xf32>
    tpu.vector_store %arg6[%c0_9, %c0_10], %17 {strides = array<i32>} : memref<2x1xf32, #tpu.memory_space<vmem>>, vector<2x1xf32>,
    %c0_11 = arith.constant 0 : index
    %c0_12 = arith.constant 0 : index
    %19 = vector.load %arg7[%c0_11, %c0_12] : memref<2x32xf32, #tpu.memory_space<vmem>>, vector<2x32xf32>
    %20 = vector.broadcast %14 : vector<2x8x1xf32> to vector<2x8x32xf32>
    %21 = arith.mulf %3, %20 : vector<2x8x32xf32>
    %cst_13 = arith.constant dense<0.000000e+00> : vector<2x32xf32>
    %22 = vector.multi_reduction <add>, %21, %cst_13 [1] : vector<2x8x32xf32> to vector<2x32xf32>
    %23 = arith.addf %19, %22 : vector<2x32xf32>
    %c0_14 = arith.constant 0 : index
    %c0_15 = arith.constant 0 : index
    %24 = vector.load %arg7[%c0_14, %c0_15] : memref<2x32xf32, #tpu.memory_space<vmem>>, vector<2x32xf32>
    tpu.vector_store %arg7[%c0_14, %c0_15], %23 {strides = array<i32>} : memref<2x32xf32, #tpu.memory_space<vmem>>, vector<2x32xf32>,
    %c0_i32_16 = arith.constant 0 : i32
    %25 = arith.cmpi eq, %arg1, %c0_i32_16 : i32
    %26 = arith.extui %25 : i1 to i32
    %c0_i32_17 = arith.constant 0 : i32
    %27 = arith.cmpi ne, %26, %c0_i32_17 : i32
    scf.if %27 {
      %c0_18 = arith.constant 0 : index
      %c0_19 = arith.constant 0 : index
      %28 = vector.load %arg6[%c0_18, %c0_19] : memref<2x1xf32, #tpu.memory_space<vmem>>, vector<2x1xf32>
      %29 = tpu.reciprocal %28 : vector<2x1xf32> -> vector<2x1xf32>
      %c0_20 = arith.constant 0 : index
      %c0_21 = arith.constant 0 : index
      %30 = vector.load %arg7[%c0_20, %c0_21] : memref<2x32xf32, #tpu.memory_space<vmem>>, vector<2x32xf32>
      %31 = vector.broadcast %29 : vector<2x1xf32> to vector<2x32xf32>
      %32 = arith.mulf %30, %31 : vector<2x32xf32>
      %c0_22 = arith.constant 0 : index
      %c0_23 = arith.constant 0 : index
      %33 = vector.load %arg5[%c0_22, %c0_23] : memref<2x32xf32, #tpu.memory_space<vmem>>, vector<2x32xf32>
      tpu.vector_store %arg5[%c0_22, %c0_23], %32 {strides = array<i32>} : memref<2x32xf32, #tpu.memory_space<vmem>>, vector<2x32xf32>,
    } else {
    }
    return
  }
  func.func @transform_0(%arg0: i32, %arg1: i32) -> (i32, i32, i32) {
    %c0_i32 = arith.constant 0 : i32
    %c0_i32_0 = arith.constant 0 : i32
    return %arg0, %arg1, %c0_i32 : i32, i32, i32
  }
  func.func @transform_1(%arg0: i32, %arg1: i32) -> (i32, i32) {
    %c0_i32 = arith.constant 0 : i32
    %c0_i32_0 = arith.constant 0 : i32
    %c0_i32_1 = arith.constant 0 : i32
    return %c0_i32, %c0_i32_0 : i32, i32
  }
  func.func @transform_2(%arg0: i32, %arg1: i32) -> i32 {
    %c0_i32 = arith.constant 0 : i32
    %c0_i32_0 = arith.constant 0 : i32
    return %c0_i32 : i32
  }
  func.func @transform_3(%arg0: i32, %arg1: i32) -> (i32, i32) {
    %c0_i32 = arith.constant 0 : i32
    %c0_i32_0 = arith.constant 0 : i32
    return %arg0, %c0_i32 : i32, i32
  }
}

</mosaic_0001>

<bundles_post_ra>
// kernel: tpu_custom_call.1
= control target key start
LH: loop header
LB: loop body
LE: loop exit
PB: predicated region body
PF: predicated region fallthrough
CT: control target
= control target key end

     0   :  { %9 = vsyncpa [#allocation6], 0  ;;  %s271_s0 = inlined_call_operand.hbm [shape: f32[2,8,32], index: 0, kind: input, shape index: {}]   ;;  %s272_s1 = inlined_call_operand.vmem [shape: f32[1,32], index: 1, kind: input, shape index: {}]   ;;  %s273_s2 = inlined_call_operand.<no memory space> [shape: f32[1], index: 2, kind: input, shape index: {}]   ;;  %s274_s3 = inlined_call_operand.hbm [shape: f32[2,32], index: 3, kind: output, shape index: {}]  }
   0x1   :  { %10 = vsyncpa [#allocation7], 0  ;;  %s206_s12 = smov [#allocation5]   ;;  %s158_s16 = scalar_lea.hbm %s271_s0, 256 }
   0x2   :  { %s16_s13 = sshll.u32 %s206_s12, 4  ;;  %p159_p0 = scmp.ne.s32.totalorder %s271_s0, %s158_s16  ;;  %s17_s13 = int_to_ptr.vmem [resolvable:$true] %s16_s13 }
   0x3   :  { %p162_p1 = scmp.lt.u32.totalorder %s158_s16, %s271_s0 }
   0x5   :  { %p164_p2 = pnand %p162_p1, %p159_p0 }
   0x7   :  { %167 = shalt.err (!%p164_p2)
}
   0x8   :  { %s168_s21 = scalar_lea.vmem %s17_s13, 256  ;;  %p173_p4 = scmp.lt.s32.totalorder %s17_s13, %s17_s13 }
   0x9   :  { %p169_p3 = scmp.ne.s32.totalorder %s17_s13, %s168_s21  ;;  %p174_p5 = scmp.lt.s32.totalorder %s168_s21, %s168_s21 }
   0xb   :  { %p175_p6 = por %p174_p5, %p173_p4 }
   0xd   :  { %p176_p7 = pnand %p175_p6, %p169_p3 }
   0xf   :  { %179 = shalt.err (!%p176_p7)
}
  0x10   :  { %s207_s22 = smov 128   ;;  %s208_s23 = smov 8  }
  0x11   :  { %22 = dma.hbm_to_vmem [thread:$0]  %s271_s0, 256, %s17_s13, [#allocation6], %s207_s22, %s207_s22, %s208_s23  }
  0x12   :  { %202 = dma.done.wait [#allocation6], 256  }
  0x13   :  { %203 = vsyncadd [#allocation6], 4294967040  ;;  %vm34_vm0 = vcmask 1024   ;;  %v209_v0 = vmov 0.0   ;;  %v38_v1 = vld [vmem:[#allocation5] sm:$0xff]  ;;  %vm49_vm1 = vcmask 261120   ;;  %v57_v9 = vstv %s273_s2 }
  0x14   :  { %35 = vst.msk [vmem:[#allocation2] sm:$0x3] %vm34_vm0, %v209_v0  ;;  %v139_v2 = vld [vmem:[%s272_s1] ss:$0 sm:$0xff]  ;;  %v39_v3 = vld [vmem:[#allocation5 + $0x8] sm:$0xff]  ;;  %vm36_vm2 = vcmask 254976  }
  0x15   :  { %v47_v4 = vmul.f32 %v139_v2, %v38_v1  ;;  %v48_v5 = vmul.f32 %v139_v2, %v39_v3  ;;  %37 = vst.msk [vmem:[#allocation3] sm:$0x3] %vm36_vm2, %v209_v0  ;;  %v210_v8 = vmov 0   ;;  %vm81_vm3 = vcmask 1041409   ;;  %s211_s1 = smov [#allocation8]  }
  0x16   :  { %146 = vset.pattern.permute.xlu1 %v210_v8  ;;  %147 = vset.pattern.permute.xlu0 %v210_v8  ;;  %s130_s2 = sshll.u32 %s211_s1, 4  ;;  %s131_s2 = int_to_ptr.vmem [resolvable:$true] %s130_s2 }
  0x17   :  { %v50_v6 = vsel %vm49_vm1, %v47_v4, 0.0  ;;  %v53_v7 = vsel %vm49_vm1, %v48_v5, 0.0  ;;  %s180_s29 = scalar_lea.vmem %s131_s2, 32  ;;  %p185_p9 = scmp.lt.s32.totalorder %s131_s2, %s131_s2 }
  0x18   :  { %51 = vadd.xlane.f32.xlu0 %v50_v6  ;;  %p181_p8 = scmp.ne.s32.totalorder %s131_s2, %s180_s29  ;;  %p186_p10 = scmp.lt.s32.totalorder %s180_s29, %s180_s29 }
  0x1a   :  { %p187_p11 = por %p186_p10, %p185_p9 }
  0x1b   :  { %v66_v44 = vld [vmem:[#allocation2] sm:$0x3] }
  0x1c   :  { %54 = vadd.xlane.f32.xlu0 %v53_v7  ;;  %v87_v51 = vld [vmem:[#allocation3] sm:$0x3]  ;;  %p188_p12 = pnand %p187_p11, %p181_p8 }
  0xa5   :  { %v52_v10 = vpop.xlane.xlu0 %51 }
  0xa6   :  { %v58_v11 = vadd.f32 %v57_v9, %v52_v10 }
  0xa8   :  { %148 = vtanh.f32 %v58_v11 }
  0xa9   :  { %v55_v12 = vpop.xlane.xlu0 %54 }
  0xaa   :  { %v59_v13 = vadd.f32 %v57_v9, %v55_v12 }
  0xac   :  { %150 = vtanh.f32 %v59_v13 }
  0xb2   :  { %v149_v14 = vpop.eup %148 }
  0xb3   :  { %v62_v15 = vmul.f32 1.442695, %v149_v14 }
  0xb5   :  { %152 = vpow2.f32 %v62_v15 }
  0xb6   :  { %v151_v16 = vpop.eup %150 }
  0xb7   :  { %v64_v17 = vmul.f32 1.442695, %v151_v16 }
  0xb9   :  { %154 = vpow2.f32 %v64_v17 }
  0xbf   :  { %v153_v18 = vpop.eup %152 }
  0xc0   :  { %v67_v19 = vrot.slane %v153_v18, 4  ;;  %v88_v20 = vmul.f32 %v153_v18, %v38_v1 }
  0xc2   :  { %v68_v21 = vadd.f32 %v153_v18, %v67_v19  ;;  %v90_v22 = vsel %vm49_vm1, %v88_v20, 0.0 }
  0xc3   :  { %v155_v23 = vpop.eup %154  ;;  %v91_v24 = vrot.slane %v90_v22, 4 }
  0xc4   :  { %v69_v25 = vrot.slane %v68_v21, 2  ;;  %v73_v26 = vrot.slane %v155_v23, 4  ;;  %v89_v27 = vmul.f32 %v155_v23, %v39_v3 }
  0xc5   :  { %v92_v28 = vadd.f32 %v91_v24, %v90_v22 }
  0xc6   :  { %v70_v29 = vadd.f32 %v69_v25, %v68_v21  ;;  %v74_v30 = vadd.f32 %v155_v23, %v73_v26  ;;  %v97_v31 = vsel %vm49_vm1, %v89_v27, 0.0 }
  0xc7   :  { %v93_v32 = vrot.slane %v92_v28, 2  ;;  %v98_v33 = vrot.slane %v97_v31, 4 }
  0xc8   :  { %v75_v34 = vrot.slane %v74_v30, 2  ;;  %v71_v37 = vrot.slane %v70_v29, 1 }
  0xc9   :  { %v94_v35 = vadd.f32 %v93_v32, %v92_v28  ;;  %v99_v36 = vadd.f32 %v98_v33, %v97_v31 }
  0xca   :  { %v76_v38 = vadd.f32 %v75_v34, %v74_v30  ;;  %v72_v43 = vadd.f32 %v71_v37, %v70_v29 }
  0xcb   :  { %v100_v39 = vrot.slane %v99_v36, 2  ;;  %v95_v41 = vrot.slane %v94_v35, 1 }
  0xcc   :  { %v77_v40 = vrot.slane %v76_v38, 1 }
  0xcd   :  { %v101_v42 = vadd.f32 %v100_v39, %v99_v36  ;;  %v96_v48 = vadd.f32 %v95_v41, %v94_v35 }
  0xce   :  { %v78_v45 = vadd.f32 %v77_v40, %v76_v38 }
  0xcf   :  { %v102_v46 = vrot.slane %v101_v42, 1 }
  0xd0   :  { %v82_v47 = vsel %vm81_vm3, %v78_v45, %v72_v43 }
  0xd1   :  { %v84_v49 = vadd.f32 %v82_v47, %v66_v44  ;;  %v103_v50 = vadd.f32 %v102_v46, %v101_v42 }
  0xd3   :  { %v106_v52 = vsel %vm81_vm3, %v103_v50, %v96_v48  ;;  %86 = vst.msk [vmem:[#allocation2] sm:$0x3] %vm34_vm0, %v84_v49 }
  0xd4   :  { %v108_v53 = vadd.f32 %v106_v52, %v87_v51 }
  0xd6   :  { %110 = vst.msk [vmem:[#allocation3] sm:$0x3] %vm36_vm2, %v108_v53 }
  0xda   :  { %v114_v54 = vld [vmem:[#allocation2] sm:$0x3] }
  0xdb   :  { %156 = vrcp.f32 %v114_v54 }
  0xdd   :  { %v116_v56 = vld [vmem:[#allocation3] sm:$0x3] }
  0xe5   :  { %v157_v55 = vpop.eup %156 }
  0xe6   :  { %119 = vperm.xlu1 %146, %v157_v55  }
 0x165   :  { %v120_v57 = vpop.permute.xlu1 %119 }
 0x166   :  { %v122_v58 = vmul.f32 %v120_v57, %v116_v56 }
 0x168   :  { %123 = vst.msk [vmem:[#allocation8] sm:$0x3] %vm36_vm2, %v122_v58 }
 0x169   :  { %191 = shalt.err (!%p188_p12)
}
 0x16a   :  { %s192_s5 = scalar_lea.hbm %s274_s3, 32 }
 0x16b   :  { %p193_p13 = scmp.ne.s32.totalorder %s274_s3, %s192_s5  ;;  %p196_p0 = scmp.lt.u32.totalorder %s192_s5, %s274_s3 }
 0x16d   :  { %p198_p1 = pnand %p196_p0, %p193_p13 }
 0x16f   :  { %201 = shalt.err (!%p198_p1)
}
 0x170   :  { %133 = dma.vmem_to_hbm [thread:$0]  %s131_s2, 32, %s274_s3, [#allocation7]  }
 0x171   :  { %204 = dma.done.wait [#allocation7], 32  }
 0x172   :  { %205 = vsyncadd [#allocation7], 4294967264 }
 0x173   :  { %137 = vsyncpa [#allocation6], 1 }
 0x174   :  { %138 = vsyncpa [#allocation7], 1 }

</bundles_post_ra>
